<compile_context>
chip_gen: v5e
topology: v5e:2x2
jax: 0.10.0
libtpu: 0.0.40
codegen_flags: <defaults>
</compile_context>

<pallas_src>
import functools

import jax
import jax.numpy as jnp
from jax.experimental import pallas as pl
from jax.experimental.pallas import tpu as pltpu


def _round_up(x, m):
    return ((x + m - 1) // m) * m


def rbf_kernel(x_ref, w_ref, b_ref, o_ref):
    # x_ref : (TB, D)   batch tile
    # w_ref : (2D, R)   fused [ (2*c/v^2)^T ; (-1/v^2)^T ]   (resident)
    # b_ref : (1, R)    -(sum_j c^2/v^2 + 1e-8)              (resident)
    # o_ref : (TB, R)
    x = x_ref[...]
    lhs = jnp.concatenate([x, x * x], axis=-1)                 # (TB, 2D)
    acc = jnp.dot(lhs, w_ref[...], preferred_element_type=jnp.float32)  # (TB, R)
    acc = jnp.minimum(acc + b_ref[...], -1e-8)                 # clamp: phi <= exp(-1e-8)
    o_ref[...] = jnp.exp(acc).astype(o_ref.dtype)


@functools.partial(jax.jit, static_argnames=("batch_tile", "out_dtype"))
def rbf_layer(inputs, centroids, variances, *, batch_tile=1024, out_dtype=None):
    """RBF membership layer: inputs (B, D), centroids/variances (R, D) -> (B, R)."""
    B, D = inputs.shape
    R, Dc = centroids.shape
    assert D == Dc and variances.shape == (R, D)

    f32 = jnp.float32
    out_dtype = inputs.dtype if out_dtype is None else out_dtype

    x = inputs.astype(f32)
    c = centroids.astype(f32)
    v = variances.astype(f32)

    # ---- tiny O(R*D) precompute with every scalar constant folded in ----
    iv = 1.0 / (v * v)                                         # (R, D)
    w = jnp.concatenate([2.0 * c * iv, -iv], axis=1).T         # (2D, R)
    bias = (-(jnp.sum(c * c * iv, axis=1) + 1e-8)).reshape(1, R)

    # ---- batch tile: fit VMEM (also on v7x: 64 MiB physical / 32 MiB scoped);
    # no wrapper padding — the ragged last block is masked by Mosaic.
    budget = 24 * 1024 * 1024                       # conservative per-step budget
    fixed = 8 * (2 * D * R + R)                     # double-buffered weights + bias (f32)
    per_row = 4 * (2 * D + 2 * R + 2 * D + R)       # dbuf x + dbuf out + lhs/acc temps (f32)
    tb_cap = max(budget - fixed, 0) // per_row
    tb = max(8, (min(batch_tile, max(tb_cap, 8)) // 8) * 8)
    if tb >= B:
        tb = B
        if B >= 16:
            # v7x has 2 TensorCores: give the "parallel" batch axis >= 2 steps.
            tb = _round_up((B + 1) // 2, 8)
    grid = (pl.cdiv(B, tb),)

    cost = pl.CostEstimate(
        flops=int(2 * B * R * (2 * D) + 4 * B * R),
        transcendentals=int(B * R),
        bytes_accessed=int(4 * (B * D + 2 * D * R + R)
                           + B * R * jnp.dtype(out_dtype).itemsize),
    )

    # NOTE: the weight/bias BlockSpecs are grid-invariant (resident); marking
    # them pipeline_mode=pl.Buffered(1) would save one spare buffer of VMEM on
    # very large R*D, but it is not needed at these budgets.
    return pl.pallas_call(
        rbf_kernel,
        out_shape=jax.ShapeDtypeStruct((B, R), out_dtype),
        grid_spec=pltpu.PrefetchScalarGridSpec(
            num_scalar_prefetch=0,
            grid=grid,
            in_specs=[
                pl.BlockSpec((tb, D), lambda i: (i, 0)),       # x batch tile
                pl.BlockSpec((2 * D, R), lambda i: (0, 0)),    # fused weights (resident)
                pl.BlockSpec((1, R), lambda i: (0, 0)),        # bias (resident)
            ],
            out_specs=pl.BlockSpec((tb, R), lambda i: (i, 0)),
        ),
        compiler_params=pltpu.CompilerParams(
            dimension_semantics=("parallel",),                 # batch axis shards across TCs
            vmem_limit_bytes=64 * 1024 * 1024,
        ),
        cost_estimate=cost,
    )(x, w, bias)


def rbf_reference(inputs, centroids, variances):
    diff = jnp.abs(inputs[:, None, :] - centroids[None, :, :])
    sqrd = jnp.sum((diff / variances[None, :, :]) ** 2, axis=-1)
    return jnp.exp(-(sqrd + 1e-8))


if __name__ == "__main__":
    key = jax.random.PRNGKey(0)
    k1, k2, k3 = jax.random.split(key, 3)

    B = 16          # batch
    n_var = 16      # feature dim (n_var)
    n_rules = 4     # number of RBF rules

    inputs = jax.random.normal(k1, (B, n_var), dtype=jnp.float32)
    # Deterministic synthetic parameters (module __init__ would load these
    # from params['centroids'] / params['var_init']).
    centroids = jax.random.normal(k2, (n_rules, n_var), dtype=jnp.float32)
    variances = 0.5 + jax.random.uniform(k3, (n_rules, n_var), dtype=jnp.float32)

    phi = rbf_layer(inputs, centroids, variances)
    phi = jax.block_until_ready(phi)

    ref = rbf_reference(inputs, centroids, variances)
    assert phi.shape == (B, n_rules)
    assert jnp.allclose(phi, ref, rtol=1e-4, atol=1e-5), "mismatch vs reference"

    print("KERNEL_OK")
</pallas_src>

<mosaic_0001>
module attributes {stable_mosaic.version = 11 : i64} {
  func.func @rbf_kernel(%arg0: i32, %arg1: memref<8x16xf32, #tpu.memory_space<vmem>>, %arg2: memref<32x4xf32, #tpu.memory_space<vmem>>, %arg3: memref<1x4xf32, #tpu.memory_space<vmem>>, %arg4: memref<8x4xf32, #tpu.memory_space<vmem>>) attributes {dimension_semantics = [#tpu.dimension_semantics<parallel>], iteration_bounds = array<i64: 2>, scalar_prefetch = 0 : i64, scratch_operands = 0 : i64, tpu.core_type = #tpu.core_type<tc>, window_params = [{transform_indices = @transform_0, window_bounds = array<i64: 8, 16>}, {pipeline_mode = #tpu.pipeline_mode<synchronous>, transform_indices = @transform_1, window_bounds = array<i64: 32, 4>}, {pipeline_mode = #tpu.pipeline_mode<synchronous>, transform_indices = @transform_2, window_bounds = array<i64: 1, 4>}, {transform_indices = @transform_3, window_bounds = array<i64: 8, 4>}]} {
    %c0 = arith.constant 0 : index
    %c0_0 = arith.constant 0 : index
    %0 = vector.load %arg1[%c0, %c0_0] : memref<8x16xf32, #tpu.memory_space<vmem>>, vector<8x16xf32>
    %1 = arith.mulf %0, %0 : vector<8x16xf32>
    %2 = tpu.concatenate %0, %1 in 1 : vector<8x16xf32>, vector<8x16xf32> -> vector<8x32xf32>
    %c0_1 = arith.constant 0 : index
    %c0_2 = arith.constant 0 : index
    %3 = vector.load %arg2[%c0_1, %c0_2] : memref<32x4xf32, #tpu.memory_space<vmem>>, vector<32x4xf32>
    %cst = arith.constant dense<0.000000e+00> : vector<8x4xf32>
    %4 = tpu.matmul %2, %3, %cst {dimension_numbers = #tpu.dot_dimension_numbers<[1], [0], [0], [1], [0, 0, 1, 1], [], []>} : vector<8x32xf32>, vector<32x4xf32>, vector<8x4xf32> -> vector<8x4xf32>
    %c0_3 = arith.constant 0 : index
    %c0_4 = arith.constant 0 : index
    %5 = vector.load %arg3[%c0_3, %c0_4] : memref<1x4xf32, #tpu.memory_space<vmem>>, vector<1x4xf32>
    %6 = vector.broadcast %5 : vector<1x4xf32> to vector<8x4xf32>
    %7 = arith.addf %4, %6 : vector<8x4xf32>
    %cst_5 = arith.constant -9.99999993E-9 : f32
    %8 = vector.broadcast %cst_5 : f32 to vector<8x4xf32>
    %9 = arith.minimumf %7, %8 : vector<8x4xf32>
    %10 = math.exp %9 : vector<8x4xf32>
    %c0_6 = arith.constant 0 : index
    %c0_7 = arith.constant 0 : index
    %11 = vector.load %arg4[%c0_6, %c0_7] : memref<8x4xf32, #tpu.memory_space<vmem>>, vector<8x4xf32>
    tpu.vector_store %arg4[%c0_6, %c0_7], %10 {strides = array<i32>} : memref<8x4xf32, #tpu.memory_space<vmem>>, vector<8x4xf32>,
    return
  }
  func.func @transform_0(%arg0: i32) -> (i32, i32) {
    %c0_i32 = arith.constant 0 : i32
    %c0_i32_0 = arith.constant 0 : i32
    return %arg0, %c0_i32 : i32, i32
  }
  func.func @transform_1(%arg0: i32) -> (i32, i32) {
    %c0_i32 = arith.constant 0 : i32
    %c0_i32_0 = arith.constant 0 : i32
    %c0_i32_1 = arith.constant 0 : i32
    return %c0_i32, %c0_i32_0 : i32, i32
  }
  func.func @transform_2(%arg0: i32) -> (i32, i32) {
    %c0_i32 = arith.constant 0 : i32
    %c0_i32_0 = arith.constant 0 : i32
    %c0_i32_1 = arith.constant 0 : i32
    return %c0_i32, %c0_i32_0 : i32, i32
  }
  func.func @transform_3(%arg0: i32) -> (i32, i32) {
    %c0_i32 = arith.constant 0 : i32
    %c0_i32_0 = arith.constant 0 : i32
    return %arg0, %c0_i32 : i32, i32
  }
}

</mosaic_0001>

<bundles_post_ra>
// kernel: rbf_layer.1
= control target key start
LH: loop header
LB: loop body
LE: loop exit
PB: predicated region body
PF: predicated region fallthrough
CT: control target
= control target key end

     0   :  { %s315_s12 = smov 0   ;;  %s347_s0 = inlined_call_operand.vmem [shape: f32[16,16], index: 0, kind: input, shape index: {}]   ;;  %s348_s1 = inlined_call_operand.vmem [shape: f32[32,4], index: 1, kind: input, shape index: {}]   ;;  %s349_s2 = inlined_call_operand.vmem [shape: f32[1,4], index: 2, kind: input, shape index: {}]   ;;  %s350_s3 = inlined_call_operand.vmem [shape: f32[16,4], index: 3, kind: output, shape index: {}]  }
   0x1 LB: > { %s264_s13 = sadd.s32 4294967295, %s292_s12   ;;  %p268_p0 = scmp.ge.s32.totalorder %s292_s12, 1  ;;  %s292_s12 = sphi %s315_s12, %s13_s12  }
   0x2   : > { %p136_p1 = scmp.lt.s32.totalorder %s292_s12, 3 }
   0x4   : > { %p137_p2 = pnand %p268_p0, %p136_p1 }
   0x5   : > { %p158_p3 = scmp.lt.s32.totalorder (!%p137_p2), %s264_s13, 1  ;;  %s294_s24 = smov (!%p137_p2), 16  }
   0x6   : > { %140 = sbr.rel (%p137_p2) target bundleno = 273 (0x111), region = 32 }
   0xb   : > { %v177_v0 = vld [vmem:[%s348_s1 + $0x18] sm:$0xff]  ;;  %v176_v1 = vld [vmem:[%s348_s1 + $0x10] sm:$0xff]  ;;  %s352_s13 = smov (!%p158_p3, %s264_s13), 1  ;;  %v175_v2 = vld [vmem:[%s348_s1 + $0x8] sm:$0xff]  ;;  %vm172_vm0 = vcmask 130048   ;;  %vm182_vm1 = vcmask 261120  }
   0xc   : > { %198 = vmatpush.msra.mxu0 %v177_v0  ;;  %s269_s20 = sshll.u32 %s352_s13, 3  ;;  %v174_v5 = vld [vmem:[%s348_s1] sm:$0xff]  ;;  %vm209_vm2 = vcmask 31744  }
   0xd   : > { %s161_s23 = scalar_lea.vmem %s347_s0, %s269_s20  ;;  %v283_v8 = vld [vmem:[%s349_s2] ss:$0 sm:$0xff]  ;;  %s165_s4 = scalar_lea.vmem %s350_s3, %s269_s20 }
   0xe   : > { %199 = vmatpush.msra.mxu0 %v176_v1  ;;  %v166_v3 = vld [vmem:[%s161_s23] sm:$0xff] }
   0xf   : > { %v167_v4 = vmul.f32 %v166_v3, %v166_v3 }
  0x10   : > { %200 = vmatpush.msra.mxu0 %v175_v2 }
  0x11   : > { %169 = vrot.lane.b32.xlu0 %v167_v4, %s294_s24 }
  0x12   : > { %201 = vmatpush.msra.mxu0 %v174_v5 }
  0x83   : > { %v170_v6 = vpop.permute.xlu0 %169 }
  0x84   : > { %v173_v7 = vsel %vm172_vm0, %v166_v3, %v170_v6 }
  0x85   : > { %271 = vmatmul.msk.f32.vlgmr.msra.gmra.mxu0 %vm182_vm1, %v173_v7 }
 0x102   : > { %v203_v9 = vpop.f32.mrf.mxu0 }
 0x103   : > { %v204_v10 = vadd.f32 %v283_v8, %v203_v9 }
 0x105   : > { %v206_v11 = vmin.f32 %v204_v10, -1e-08 }
 0x107   : > { %v207_v12 = vmul.f32 1.442695, %v206_v11 }
 0x109   : > { %284 = vpow2.f32 %v207_v12 }
 0x10f   : > { %v285_v13 = vpop.eup %284 }
 0x110   : > { %210 = vst.msk [vmem:[%s165_s4] sm:$0xff] %vm209_vm2, %v285_v13 }
 0x111 PF: > { %s13_s12 = sadd.s32 1, %s292_s12  }
 0x112   : > { %p10_p4 = scmp.ge.s32.totalorder %s13_s12, 4  }
 0x114   :  { %12 = sbr.rel (!%p10_p4) target bundleno = 1 (0x1), region = 62 }

</bundles_post_ra>
